<compile_context>
chip_gen: v7x
topology: tpu7x:2x2x1
jax: 0.10.0
libtpu: 0.0.40
codegen_flags: <defaults>
</compile_context>

<pallas_src>
import jax
import jax.numpy as jnp
from jax.experimental import pallas as pl
from jax.experimental.pallas import tpu as pltpu

STATE_SIZE = 1
HIDDEN = 24
ACTION_SIZE = 5
OUT_PAD = 8            # pad 5 -> 8 output lanes (masked store, 16x less writeback)
DEFAULT_TILE_B = 4096  # target batch rows per grid step (multiple of 8)
LANE_BYTES = 128 * 4   # any <=128-wide f32 row occupies one full lane row in VMEM


def dqn_kernel(x_ref, w1_ref, b1_ref, w2_ref, b2_ref, w3_ref, b3_ref, o_ref):
    x = x_ref[...]                                                     # [tb, 1]
    # fc1: K=1 contraction -> VPU broadcast multiply (no MXU round-trip).
    h1 = jnp.maximum(x * w1_ref[...] + b1_ref[...], 0.0)               # [tb, 24]
    # fc2: MXU matmul, fp32 accumulate.
    h2 = jnp.dot(h1, w2_ref[...], preferred_element_type=jnp.float32)  # [tb, 24]
    h2 = jnp.maximum(h2 + b2_ref[...], 0.0)
    # fc3: MXU matmul into the 8-lane padded output.
    q = jnp.dot(h2, w3_ref[...], preferred_element_type=jnp.float32)   # [tb, 8]
    o_ref[...] = (q + b3_ref[...]).astype(o_ref.dtype)


def _round_up(n, m):
    return ((n + m - 1) // m) * m


def _cdiv(a, b):
    return -(-a // b)


def dqn_forward(x, w1, b1, w2, b2, w3, b3, *, tile_b=DEFAULT_TILE_B):
    """x: [B, STATE_SIZE] float32 -> Q-values [B, ACTION_SIZE] float32."""
    B = x.shape[0]

    # --- batch tiling -------------------------------------------------------
    # At least 2 grid steps whenever the batch allows it (feeds both TCs on
    # v7x; harmless on v5e/v6e), tiles balanced to minimize padding waste, and
    # each tile a multiple of 8 sublanes.
    b8 = _round_up(max(B, 1), 8)
    tile_b = max(_round_up(tile_b, 8), 8)
    num_tiles = max(2, _cdiv(b8, tile_b))
    tb = min(_round_up(_cdiv(b8, num_tiles), 8), tile_b)
    tb = max(tb, 8)
    B_pad = _round_up(B, tb)
    if B_pad != B:
        x = jnp.pad(x, ((0, B_pad - B), (0, 0)))
    grid = (B_pad // tb,)

    # --- lane padding of fc3 to OUT_PAD (=8) lanes --------------------------
    w3p = jnp.pad(w3, ((0, 0), (0, OUT_PAD - ACTION_SIZE)))            # [24, 8]
    b3p = jnp.pad(b3, ((0, 0), (0, OUT_PAD - ACTION_SIZE)))            # [1, 8]

    # --- VMEM budget (computed, not blanket) --------------------------------
    # x tile [tb,1] and out tile [tb,8] each physically occupy tb*128 lanes*4B;
    # double-buffered. h1/h2/q temporaries ~3 lane-rows per batch row.
    vmem_est = (2 * tb * LANE_BYTES          # x, double-buffered
                + 2 * tb * LANE_BYTES        # out, double-buffered
                + 3 * tb * LANE_BYTES        # h1/h2/q temporaries
                + 64 * 1024)                 # resident weights/biases + slack
    vmem_limit = int(min(max(int(vmem_est * 1.5), 8 * 1024 * 1024),
                         24 * 1024 * 1024))

    # --- cost estimate for the XLA scheduler --------------------------------
    flops = 2 * B_pad * (STATE_SIZE * HIDDEN + HIDDEN * HIDDEN + HIDDEN * OUT_PAD)
    weight_bytes = 4 * (STATE_SIZE * HIDDEN + HIDDEN + HIDDEN * HIDDEN + HIDDEN
                        + HIDDEN * OUT_PAD + OUT_PAD)
    bytes_accessed = B_pad * 4 * (STATE_SIZE + OUT_PAD) + weight_bytes
    cost = pl.CostEstimate(flops=flops, transcendentals=0,
                           bytes_accessed=bytes_accessed)

    # Weights/biases: full-array blocks with a constant index_map -> loaded
    # once and resident in VMEM across all batch tiles.
    def resident(a):
        return pl.BlockSpec(a.shape, lambda i: (0, 0))

    out = pl.pallas_call(
        dqn_kernel,
        out_shape=jax.ShapeDtypeStruct((B_pad, OUT_PAD), jnp.float32),
        grid=grid,
        in_specs=[
            pl.BlockSpec((tb, STATE_SIZE), lambda i: (i, 0)),   # x: batch tiled
            resident(w1), resident(b1),
            resident(w2), resident(b2),
            resident(w3p), resident(b3p),
        ],
        # Last dim (8) equals the full array dim -> legal block; masked vst.
        out_specs=pl.BlockSpec((tb, OUT_PAD), lambda i: (i, 0)),
        compiler_params=pltpu.CompilerParams(
            dimension_semantics=("parallel",),
            vmem_limit_bytes=vmem_limit,
        ),
        cost_estimate=cost,
    )(x, w1, b1, w2, b2, w3p, b3p)

    return out[:B, :ACTION_SIZE]


def init_linear(key, fan_in, fan_out):
    """Deterministic init mimicking nn.Linear default (uniform +/- 1/sqrt(fan_in))."""
    kw, kb = jax.random.split(key)
    bound = 1.0 / jnp.sqrt(jnp.float32(fan_in))
    # stored as [in, out] so the kernel computes x @ W (same math as nn.Linear)
    w = jax.random.uniform(kw, (fan_in, fan_out), jnp.float32, -bound, bound)
    # biases kept 2D [1, out] for clean TPU layout / broadcasting
    b = jax.random.uniform(kb, (1, fan_out), jnp.float32, -bound, bound)
    return w, b


def reference_forward(x, w1, b1, w2, b2, w3, b3):
    h1 = jnp.maximum(x @ w1 + b1, 0.0)
    h2 = jnp.maximum(h1 @ w2 + b2, 0.0)
    return h2 @ w3 + b3


if __name__ == "__main__":
    key = jax.random.PRNGKey(0)
    k_x, k1, k2, k3 = jax.random.split(key, 4)

    w1, b1 = init_linear(k1, STATE_SIZE, HIDDEN)
    w2, b2 = init_linear(k2, HIDDEN, HIDDEN)
    w3, b3 = init_linear(k3, HIDDEN, ACTION_SIZE)

    # Small batch (single tile).
    batch = 8
    x = jax.random.normal(k_x, (batch, STATE_SIZE), jnp.float32)
    q = jax.block_until_ready(dqn_forward(x, w1, b1, w2, b2, w3, b3))
    q_ref = reference_forward(x, w1, b1, w2, b2, w3, b3)
    assert q.shape == (batch, ACTION_SIZE)
    assert jnp.allclose(q, q_ref, atol=1e-5, rtol=1e-5)

    # Non-multiple batch exercising the multi-tile grid + padding path.
    batch2 = 300
    x2 = jax.random.normal(k_x, (batch2, STATE_SIZE), jnp.float32)
    q2 = jax.block_until_ready(dqn_forward(x2, w1, b1, w2, b2, w3, b3, tile_b=128))
    q2_ref = reference_forward(x2, w1, b1, w2, b2, w3, b3)
    assert q2.shape == (batch2, ACTION_SIZE)
    assert jnp.allclose(q2, q2_ref, atol=1e-5, rtol=1e-5)

    # Default (large) tile path, still >= 2 grid steps.
    batch3 = 300
    q3 = jax.block_until_ready(dqn_forward(x2, w1, b1, w2, b2, w3, b3))
    assert q3.shape == (batch3, ACTION_SIZE)
    assert jnp.allclose(q3, q2_ref, atol=1e-5, rtol=1e-5)

    print("KERNEL_OK")
</pallas_src>

<mosaic_0001>
module attributes {stable_mosaic.version = 11 : i64} {
  func.func @dqn_kernel(%arg0: i32, %arg1: memref<8x1xf32, #tpu.memory_space<vmem>>, %arg2: memref<1x24xf32, #tpu.memory_space<vmem>>, %arg3: memref<1x24xf32, #tpu.memory_space<vmem>>, %arg4: memref<24x24xf32, #tpu.memory_space<vmem>>, %arg5: memref<1x24xf32, #tpu.memory_space<vmem>>, %arg6: memref<24x8xf32, #tpu.memory_space<vmem>>, %arg7: memref<1x8xf32, #tpu.memory_space<vmem>>, %arg8: memref<8x8xf32, #tpu.memory_space<vmem>>) attributes {dimension_semantics = [#tpu.dimension_semantics<parallel>], iteration_bounds = array<i64: 1>, scalar_prefetch = 0 : i64, scratch_operands = 0 : i64, tpu.core_type = #tpu.core_type<tc>, window_params = [{transform_indices = @transform_0, window_bounds = array<i64: 8, 1>}, {pipeline_mode = #tpu.pipeline_mode<synchronous>, transform_indices = @transform_1, window_bounds = array<i64: 1, 24>}, {pipeline_mode = #tpu.pipeline_mode<synchronous>, transform_indices = @transform_2, window_bounds = array<i64: 1, 24>}, {pipeline_mode = #tpu.pipeline_mode<synchronous>, transform_indices = @transform_3, window_bounds = array<i64: 24, 24>}, {pipeline_mode = #tpu.pipeline_mode<synchronous>, transform_indices = @transform_4, window_bounds = array<i64: 1, 24>}, {pipeline_mode = #tpu.pipeline_mode<synchronous>, transform_indices = @transform_5, window_bounds = array<i64: 24, 8>}, {pipeline_mode = #tpu.pipeline_mode<synchronous>, transform_indices = @transform_6, window_bounds = array<i64: 1, 8>}, {transform_indices = @transform_7, window_bounds = array<i64: 8, 8>}]} {
    %c0 = arith.constant 0 : index
    %c0_0 = arith.constant 0 : index
    %0 = vector.load %arg1[%c0, %c0_0] : memref<8x1xf32, #tpu.memory_space<vmem>>, vector<8x1xf32>
    %c0_1 = arith.constant 0 : index
    %c0_2 = arith.constant 0 : index
    %1 = vector.load %arg2[%c0_1, %c0_2] : memref<1x24xf32, #tpu.memory_space<vmem>>, vector<1x24xf32>
    %2 = vector.broadcast %0 : vector<8x1xf32> to vector<8x24xf32>
    %3 = vector.broadcast %1 : vector<1x24xf32> to vector<8x24xf32>
    %4 = arith.mulf %2, %3 : vector<8x24xf32>
    %c0_3 = arith.constant 0 : index
    %c0_4 = arith.constant 0 : index
    %5 = vector.load %arg3[%c0_3, %c0_4] : memref<1x24xf32, #tpu.memory_space<vmem>>, vector<1x24xf32>
    %6 = vector.broadcast %5 : vector<1x24xf32> to vector<8x24xf32>
    %7 = arith.addf %4, %6 : vector<8x24xf32>
    %cst = arith.constant 0.000000e+00 : f32
    %8 = vector.broadcast %cst : f32 to vector<8x24xf32>
    %9 = arith.maximumf %7, %8 : vector<8x24xf32>
    %c0_5 = arith.constant 0 : index
    %c0_6 = arith.constant 0 : index
    %10 = vector.load %arg4[%c0_5, %c0_6] : memref<24x24xf32, #tpu.memory_space<vmem>>, vector<24x24xf32>
    %cst_7 = arith.constant dense<0.000000e+00> : vector<8x24xf32>
    %11 = tpu.matmul %9, %10, %cst_7 {dimension_numbers = #tpu.dot_dimension_numbers<[1], [0], [0], [1], [0, 0, 1, 1], [], []>} : vector<8x24xf32>, vector<24x24xf32>, vector<8x24xf32> -> vector<8x24xf32>
    %c0_8 = arith.constant 0 : index
    %c0_9 = arith.constant 0 : index
    %12 = vector.load %arg5[%c0_8, %c0_9] : memref<1x24xf32, #tpu.memory_space<vmem>>, vector<1x24xf32>
    %13 = vector.broadcast %12 : vector<1x24xf32> to vector<8x24xf32>
    %14 = arith.addf %11, %13 : vector<8x24xf32>
    %cst_10 = arith.constant 0.000000e+00 : f32
    %15 = vector.broadcast %cst_10 : f32 to vector<8x24xf32>
    %16 = arith.maximumf %14, %15 : vector<8x24xf32>
    %c0_11 = arith.constant 0 : index
    %c0_12 = arith.constant 0 : index
    %17 = vector.load %arg6[%c0_11, %c0_12] : memref<24x8xf32, #tpu.memory_space<vmem>>, vector<24x8xf32>
    %cst_13 = arith.constant dense<0.000000e+00> : vector<8x8xf32>
    %18 = tpu.matmul %16, %17, %cst_13 {dimension_numbers = #tpu.dot_dimension_numbers<[1], [0], [0], [1], [0, 0, 1, 1], [], []>} : vector<8x24xf32>, vector<24x8xf32>, vector<8x8xf32> -> vector<8x8xf32>
    %c0_14 = arith.constant 0 : index
    %c0_15 = arith.constant 0 : index
    %19 = vector.load %arg7[%c0_14, %c0_15] : memref<1x8xf32, #tpu.memory_space<vmem>>, vector<1x8xf32>
    %20 = vector.broadcast %19 : vector<1x8xf32> to vector<8x8xf32>
    %21 = arith.addf %18, %20 : vector<8x8xf32>
    %c0_16 = arith.constant 0 : index
    %c0_17 = arith.constant 0 : index
    %22 = vector.load %arg8[%c0_16, %c0_17] : memref<8x8xf32, #tpu.memory_space<vmem>>, vector<8x8xf32>
    tpu.vector_store %arg8[%c0_16, %c0_17], %21 {strides = array<i32>} : memref<8x8xf32, #tpu.memory_space<vmem>>, vector<8x8xf32>,
    return
  }
  func.func @transform_0(%arg0: i32) -> (i32, i32) {
    %c0_i32 = arith.constant 0 : i32
    %c0_i32_0 = arith.constant 0 : i32
    return %arg0, %c0_i32 : i32, i32
  }
  func.func @transform_1(%arg0: i32) -> (i32, i32) {
    %c0_i32 = arith.constant 0 : i32
    %c0_i32_0 = arith.constant 0 : i32
    %c0_i32_1 = arith.constant 0 : i32
    return %c0_i32, %c0_i32_0 : i32, i32
  }
  func.func @transform_2(%arg0: i32) -> (i32, i32) {
    %c0_i32 = arith.constant 0 : i32
    %c0_i32_0 = arith.constant 0 : i32
    %c0_i32_1 = arith.constant 0 : i32
    return %c0_i32, %c0_i32_0 : i32, i32
  }
  func.func @transform_3(%arg0: i32) -> (i32, i32) {
    %c0_i32 = arith.constant 0 : i32
    %c0_i32_0 = arith.constant 0 : i32
    %c0_i32_1 = arith.constant 0 : i32
    return %c0_i32, %c0_i32_0 : i32, i32
  }
  func.func @transform_4(%arg0: i32) -> (i32, i32) {
    %c0_i32 = arith.constant 0 : i32
    %c0_i32_0 = arith.constant 0 : i32
    %c0_i32_1 = arith.constant 0 : i32
    return %c0_i32, %c0_i32_0 : i32, i32
  }
  func.func @transform_5(%arg0: i32) -> (i32, i32) {
    %c0_i32 = arith.constant 0 : i32
    %c0_i32_0 = arith.constant 0 : i32
    %c0_i32_1 = arith.constant 0 : i32
    return %c0_i32, %c0_i32_0 : i32, i32
  }
  func.func @transform_6(%arg0: i32) -> (i32, i32) {
    %c0_i32 = arith.constant 0 : i32
    %c0_i32_0 = arith.constant 0 : i32
    %c0_i32_1 = arith.constant 0 : i32
    return %c0_i32, %c0_i32_0 : i32, i32
  }
  func.func @transform_7(%arg0: i32) -> (i32, i32) {
    %c0_i32 = arith.constant 0 : i32
    %c0_i32_0 = arith.constant 0 : i32
    return %arg0, %c0_i32 : i32, i32
  }
}

</mosaic_0001>

<bundles_post_ra>
// kernel: tpu_custom_call.1
= control target key start
LH: loop header
LB: loop body
LE: loop exit
PB: predicated region body
PF: predicated region fallthrough
CT: control target
= control target key end

     0   :  { %v302_v1 = vmov 0   ;;  %s392_s0 = inlined_call_operand.vmem [shape: f32[8,1], index: 0, kind: input, shape index: {}]   ;;  %s393_s1 = inlined_call_operand.vmem [shape: f32[1,24], index: 1, kind: input, shape index: {}]   ;;  %s394_s2 = inlined_call_operand.vmem [shape: f32[1,24], index: 2, kind: input, shape index: {}]   ;;  %s395_s3 = inlined_call_operand.vmem [shape: f32[24,24], index: 3, kind: input, shape index: {}]   ;;  %s396_s4 = inlined_call_operand.vmem [shape: f32[1,24], index: 4, kind: input, shape index: {}]   ;;  %s397_s5 = inlined_call_operand.vmem [shape: f32[24,8], index: 5, kind: input, shape index: {}]   ;;  %s398_s6 = inlined_call_operand.vmem [shape: f32[1,8], index: 6, kind: input, shape index: {}]   ;;  %s399_s7 = inlined_call_operand.hbm [shape: f32[8,8], index: 7, kind: output, shape index: {}]  }
   0x1   :  { %v27_v0 = vld [vmem:[%s392_s0] sm:$0xff]  ;;  %277 = vset.pattern.permute.xlu0 %v302_v1  ;;  %v51_v3 = vld [vmem:[%s395_s3 + $0x8] sm:$0xff] }
   0x2   :  { %v50_v2 = vld [vmem:[%s395_s3] sm:$0xff] }
   0x3   :  { %12 = vsyncpa [#allocation3], 0  ;;  %31 = vperm.xlu0 %277, %v27_v0   ;;  %v303_v4 = vmov 0.0|0.0   ;;  %v267_v5 = vpack.c.bf16 %v51_v3, %v50_v2  ;;  %v304_v6 = vmov 0.0   ;;  %v52_v7 = vld [vmem:[%s395_s3 + $0x10] sm:$0xff]  ;;  %vm305_vm0 = vmmov 0  }
   0x4   :  { %266 = vmatprep.subr.bf16.mxu0 %v303_v4  ;;  %269 = vmatprep.subr.bf16.mxu1 %v303_v4  ;;  %v234_v8 = vld [vmem:[%s393_s1] ss:$0 sm:$0xff]  ;;  %vm60_vm1 = vcmask 195584   ;;  %v136_v15 = vld [vmem:[%s397_s5 + $0x8] sm:$0xff]  ;;  %v137_v17 = vld [vmem:[%s397_s5 + $0x10] sm:$0xff]  ;;  %s306_s19 = smov [#allocation2]  }
   0x5   :  { %268 = vmatpush3.bf16.msra.mxu0 %v267_v5  ;;  %254 = vmatprep.mubr.msk.f32.mxu0 %vm305_vm0, %v304_v6  ;;  %v235_v9 = vld [vmem:[%s394_s2] ss:$0 sm:$0xff]  ;;  %s226_s20 = sshll.u32 %s306_s19, 4  ;;  %vm218_vm2 = vcmask 64512   ;;  %s227_s20 = int_to_ptr.vmem [resolvable:$true] %s226_s20 }
   0x6   :  { %252 = vmatprep.subr.mxu0 %v304_v6  ;;  %263 = vmatprep.mubr.msk.f32.mxu1 %vm305_vm0, %v304_v6  ;;  %v135_v14 = vld [vmem:[%s397_s5] sm:$0xff]  ;;  %s278_s5 = scalar_lea.vmem %s227_s20, 128  ;;  %p283_p1 = scmp.lt.s32.totalorder %s227_s20, %s227_s20 }
   0x7   :  { %v270_v16 = vpack.c.bf16 %v136_v15, %v135_v14  ;;  %v236_v18 = vld [vmem:[%s396_s4] ss:$0 sm:$0xff]  ;;  %p279_p0 = scmp.ne.s32.totalorder %s227_s20, %s278_s5  ;;  %p284_p2 = scmp.lt.s32.totalorder %s278_s5, %s278_s5 }
   0x8   :  { %v238_v23 = vld [vmem:[%s398_s6] ss:$0 sm:$0xff] }
   0x9   :  { %253 = vmatpush3.msra.mxu0 %v52_v7  ;;  %271 = vmatpush3.bf16.msra.mxu1 %v270_v16  ;;  %p285_p3 = por %p284_p2, %p283_p1 }
   0xa   :  { %261 = vmatprep.subr.mxu1 %v304_v6 }
   0xb   :  { %p286_p4 = pnand %p285_p3, %p279_p0 }
   0xd   :  { %262 = vmatpush3.msra.mxu1 %v137_v17 }
  0x82   :  { %v32_v10 = vpop.permute.xlu0 %31 }
  0x83   :  { %v40_v11 = vmul.f32 %v234_v8, %v32_v10 }
  0x85   :  { %v48_v12 = vadd.f32 %v235_v9, %v40_v11 }
  0x87   :  { %v49_v13 = vmax.f32 %v48_v12, 0.0 }
  0x89   :  { %255 = vmatmul.mubr.msk.f32.vlgmr.msra.gmra.mrb[0].mxu0 %vm60_vm1, %v49_v13 }
 0x15c   :  { %v130_v19 = vpop.f32.mrb[0].mxu0 }
 0x15d   :  { %v131_v20 = vadd.f32 %v236_v18, %v130_v19  ;;  %v256_v21 = vpop.f32.mrb[1].mxu0 }
 0x15f   :  { %v134_v22 = vmax.f32 %v131_v20, 0.0 }
 0x161   :  { %264 = vmatmul.mubr.msk.f32.vlgmr.msra.gmra.mrb[0].mxu1 %vm60_vm1, %v134_v22 }
 0x234   :  { %v214_v24 = vpop.f32.mrb[0].mxu1 }
 0x235   :  { %v215_v25 = vadd.f32 %v238_v23, %v214_v24  ;;  %v265_v26 = vpop.f32.mrb[1].mxu1 }
 0x237   :  { %219 = vst.msk [vmem:[#allocation2] sm:$0xff] %vm218_vm2, %v215_v25 }
 0x238   :  { %289 = shalt.err (!%p286_p4)
}
 0x239   :  { %s290_s22 = scalar_lea.hbm %s399_s7, 128 }
 0x23a   :  { %p291_p5 = scmp.ne.s32.totalorder %s399_s7, %s290_s22  ;;  %p294_p6 = scmp.lt.u32.totalorder %s290_s22, %s399_s7 }
 0x23c   :  { %p296_p7 = pnand %p294_p6, %p291_p5 }
 0x23e   :  { %299 = shalt.err (!%p296_p7)
}
 0x23f   :  { %229 = dma.vmem_to_hbm [thread:$0]  %s227_s20, 128, %s399_s7, [#allocation3]  }
 0x240   :  { %300 = dma.done.wait [#allocation3], 128  }
 0x241   :  { %301 = vsyncadd [#allocation3], 4294967168 }
 0x242   :  { %233 = vsyncpa [#allocation3], 1 }

</bundles_post_ra>
